<compile_context>
chip_gen: v7x
topology: tpu7x:2x2x1
jax: 0.10.0
libtpu: 0.0.40
codegen_flags: <defaults>
</compile_context>

<pallas_src>
import jax
import jax.numpy as jnp
from jax.experimental import pallas as pl
from jax.experimental.pallas import tpu as pltpu


def _round_up(n, m):
    return ((n + m - 1) // m) * m


def mlpae_kernel(x_ref, w0_ref, b0_ref, w1_ref, b1_ref, o_ref):
    # x_ref : [tile_rows, F]      w0_ref: [F, H_pad]   b0_ref: [1, H_pad]
    # w1_ref: [H_pad, F]          b1_ref: [1, F]       o_ref : [tile_rows, F]
    h = jnp.dot(x_ref[...], w0_ref[...], preferred_element_type=jnp.float32)
    h = jnp.maximum(h + b0_ref[...], 0.0)                      # Linear -> ReLU
    out = jnp.dot(h, w1_ref[...], preferred_element_type=jnp.float32)
    o_ref[...] = (out + b1_ref[...]).astype(o_ref.dtype)       # second Linear


def mlpae_forward(x, w0, b0, w1, b1, *, tile_rows=None):
    """Eval-mode forward of MLPAEModel.

    x : [N, F] node features.
    w0: [H, F], b0: [H]  -- first nn.Linear (PyTorch [out, in] layout)
    w1: [F, H], b1: [F]  -- second nn.Linear
    Returns the reconstructed node features, shape [N, F].
    """
    N, F = x.shape
    H = w0.shape[0]
    H_pad = _round_up(H, 128)          # lane-dense intermediate activation

    # Auto tile: keep the widest per-step VMEM buffer (~max(F, H_pad) lanes wide) near 2 MiB.
    if tile_rows is None:
        widest = max(F, H_pad)
        tile_rows = max(8, ((1 << 21) // (widest * x.dtype.itemsize)) // 8 * 8)
    tile_rows = _round_up(max(8, int(tile_rows)), 8)
    tile_rows = min(tile_rows, _round_up(N, 8))    # don't over-pad tiny inputs
    n_pad = _round_up(N, tile_rows)

    if n_pad != N:
        x = jnp.pad(x, ((0, n_pad - N), (0, 0)))   # padded rows are sliced away at the end

    f32 = jnp.float32
    # Pre-transpose to [in, out] and zero-pad the hidden dim to a multiple of 128.
    w0t = jnp.zeros((F, H_pad), f32).at[:, :H].set(w0.T.astype(f32))
    b0p = jnp.zeros((1, H_pad), f32).at[:, :H].set(b0.astype(f32))
    w1t = jnp.zeros((H_pad, F), f32).at[:H, :].set(w1.T.astype(f32))
    b1p = b1.astype(f32).reshape(1, F)

    grid = (n_pad // tile_rows,)

    cost = pl.CostEstimate(
        flops=4 * n_pad * F * H_pad,                               # two matmuls
        transcendentals=0,
        bytes_accessed=2 * n_pad * F * x.dtype.itemsize            # x in + out
        + (2 * F * H_pad + H_pad + F) * 4,                         # resident weights/biases
    )

    out = pl.pallas_call(
        mlpae_kernel,
        out_shape=jax.ShapeDtypeStruct((n_pad, F), x.dtype),
        grid=grid,
        in_specs=[
            pl.BlockSpec((tile_rows, F), lambda i: (i, 0)),   # x row slab
            pl.BlockSpec((F, H_pad), lambda i: (0, 0)),       # W0^T (resident in VMEM)
            pl.BlockSpec((1, H_pad), lambda i: (0, 0)),       # b0   (resident)
            pl.BlockSpec((H_pad, F), lambda i: (0, 0)),       # W1^T (resident)
            pl.BlockSpec((1, F), lambda i: (0, 0)),           # b1   (resident)
        ],
        out_specs=pl.BlockSpec((tile_rows, F), lambda i: (i, 0)),
        compiler_params=pltpu.CompilerParams(
            dimension_semantics=("parallel",),
        ),
        cost_estimate=cost,
    )(x, w0t, b0p, w1t, b1p)

    return out[:N]


def init_params(key, feat_size, hidden_dim):
    """Deterministic init mimicking nn.Linear (PyTorch layout: weight [out, in])."""
    k0, k1, k2, k3 = jax.random.split(key, 4)
    lim0 = 1.0 / jnp.sqrt(feat_size)
    lim1 = 1.0 / jnp.sqrt(hidden_dim)
    w0 = jax.random.uniform(k0, (hidden_dim, feat_size), jnp.float32, -lim0, lim0)
    b0 = jax.random.uniform(k1, (hidden_dim,), jnp.float32, -lim0, lim0)
    w1 = jax.random.uniform(k2, (feat_size, hidden_dim), jnp.float32, -lim1, lim1)
    b1 = jax.random.uniform(k3, (feat_size,), jnp.float32, -lim1, lim1)
    return w0, b0, w1, b1


if __name__ == "__main__":
    # Small shapes consistent with MLPAEModel(feat_size=16, hidden_dim=64, n_layers=2).
    # N is deliberately NOT a multiple of the tile so the padding path is exercised, and a
    # small explicit tile is used once so the multi-step grid path is exercised too.
    N, feat_size, hidden_dim = 300, 16, 64

    key = jax.random.PRNGKey(0)
    kx, kp = jax.random.split(key)
    x = jax.random.normal(kx, (N, feat_size), jnp.float32)
    w0, b0, w1, b1 = init_params(kp, feat_size, hidden_dim)

    out = jax.block_until_ready(mlpae_forward(x, w0, b0, w1, b1, tile_rows=64))

    # Pure-JAX reference (same math as the PyTorch eval-mode forward):
    #   out = relu(x @ W0.T + b0) @ W1.T + b1
    # written as broadcast-multiply + sum so it is independent of XLA's TPU matmul
    # precision defaults.
    h_ref = jnp.maximum((x[:, None, :] * w0[None, :, :]).sum(-1) + b0, 0.0)
    ref = (h_ref[:, None, :] * w1[None, :, :]).sum(-1) + b1

    assert out.shape == (N, feat_size)
    assert jnp.allclose(out, ref, atol=1e-4, rtol=1e-4), "mismatch vs reference (multi-tile)"

    # Default auto-tiled (single-slab) path.
    out2 = jax.block_until_ready(mlpae_forward(x, w0, b0, w1, b1))
    assert jnp.allclose(out2, ref, atol=1e-4, rtol=1e-4), "mismatch vs reference (auto tile)"

    print("KERNEL_OK")
</pallas_src>

<mosaic_0001>
module attributes {stable_mosaic.version = 11 : i64} {
  func.func @mlpae_kernel(%arg0: i32, %arg1: memref<64x16xf32, #tpu.memory_space<vmem>>, %arg2: memref<16x128xf32, #tpu.memory_space<vmem>>, %arg3: memref<1x128xf32, #tpu.memory_space<vmem>>, %arg4: memref<128x16xf32, #tpu.memory_space<vmem>>, %arg5: memref<1x16xf32, #tpu.memory_space<vmem>>, %arg6: memref<64x16xf32, #tpu.memory_space<vmem>>) attributes {dimension_semantics = [#tpu.dimension_semantics<parallel>], iteration_bounds = array<i64: 5>, scalar_prefetch = 0 : i64, scratch_operands = 0 : i64, tpu.core_type = #tpu.core_type<tc>, window_params = [{transform_indices = @transform_0, window_bounds = array<i64: 64, 16>}, {pipeline_mode = #tpu.pipeline_mode<synchronous>, transform_indices = @transform_1, window_bounds = array<i64: 16, 128>}, {pipeline_mode = #tpu.pipeline_mode<synchronous>, transform_indices = @transform_2, window_bounds = array<i64: 1, 128>}, {pipeline_mode = #tpu.pipeline_mode<synchronous>, transform_indices = @transform_3, window_bounds = array<i64: 128, 16>}, {pipeline_mode = #tpu.pipeline_mode<synchronous>, transform_indices = @transform_4, window_bounds = array<i64: 1, 16>}, {transform_indices = @transform_5, window_bounds = array<i64: 64, 16>}]} {
    %c0 = arith.constant 0 : index
    %c0_0 = arith.constant 0 : index
    %0 = vector.load %arg1[%c0, %c0_0] : memref<64x16xf32, #tpu.memory_space<vmem>>, vector<64x16xf32>
    %c0_1 = arith.constant 0 : index
    %c0_2 = arith.constant 0 : index
    %1 = vector.load %arg2[%c0_1, %c0_2] : memref<16x128xf32, #tpu.memory_space<vmem>>, vector<16x128xf32>
    %cst = arith.constant dense<0.000000e+00> : vector<64x128xf32>
    %2 = tpu.matmul %0, %1, %cst {dimension_numbers = #tpu.dot_dimension_numbers<[1], [0], [0], [1], [0, 0, 1, 1], [], []>} : vector<64x16xf32>, vector<16x128xf32>, vector<64x128xf32> -> vector<64x128xf32>
    %c0_3 = arith.constant 0 : index
    %c0_4 = arith.constant 0 : index
    %3 = vector.load %arg3[%c0_3, %c0_4] : memref<1x128xf32, #tpu.memory_space<vmem>>, vector<1x128xf32>
    %4 = vector.broadcast %3 : vector<1x128xf32> to vector<64x128xf32>
    %5 = arith.addf %2, %4 : vector<64x128xf32>
    %cst_5 = arith.constant 0.000000e+00 : f32
    %6 = vector.broadcast %cst_5 : f32 to vector<64x128xf32>
    %7 = arith.maximumf %5, %6 : vector<64x128xf32>
    %c0_6 = arith.constant 0 : index
    %c0_7 = arith.constant 0 : index
    %8 = vector.load %arg4[%c0_6, %c0_7] : memref<128x16xf32, #tpu.memory_space<vmem>>, vector<128x16xf32>
    %cst_8 = arith.constant dense<0.000000e+00> : vector<64x16xf32>
    %9 = tpu.matmul %7, %8, %cst_8 {dimension_numbers = #tpu.dot_dimension_numbers<[1], [0], [0], [1], [0, 0, 1, 1], [], []>} : vector<64x128xf32>, vector<128x16xf32>, vector<64x16xf32> -> vector<64x16xf32>
    %c0_9 = arith.constant 0 : index
    %c0_10 = arith.constant 0 : index
    %10 = vector.load %arg5[%c0_9, %c0_10] : memref<1x16xf32, #tpu.memory_space<vmem>>, vector<1x16xf32>
    %11 = vector.broadcast %10 : vector<1x16xf32> to vector<64x16xf32>
    %12 = arith.addf %9, %11 : vector<64x16xf32>
    %c0_11 = arith.constant 0 : index
    %c0_12 = arith.constant 0 : index
    %13 = vector.load %arg6[%c0_11, %c0_12] : memref<64x16xf32, #tpu.memory_space<vmem>>, vector<64x16xf32>
    tpu.vector_store %arg6[%c0_11, %c0_12], %12 {strides = array<i32>} : memref<64x16xf32, #tpu.memory_space<vmem>>, vector<64x16xf32>,
    return
  }
  func.func @transform_0(%arg0: i32) -> (i32, i32) {
    %c0_i32 = arith.constant 0 : i32
    %c0_i32_0 = arith.constant 0 : i32
    return %arg0, %c0_i32 : i32, i32
  }
  func.func @transform_1(%arg0: i32) -> (i32, i32) {
    %c0_i32 = arith.constant 0 : i32
    %c0_i32_0 = arith.constant 0 : i32
    %c0_i32_1 = arith.constant 0 : i32
    return %c0_i32, %c0_i32_0 : i32, i32
  }
  func.func @transform_2(%arg0: i32) -> (i32, i32) {
    %c0_i32 = arith.constant 0 : i32
    %c0_i32_0 = arith.constant 0 : i32
    %c0_i32_1 = arith.constant 0 : i32
    return %c0_i32, %c0_i32_0 : i32, i32
  }
  func.func @transform_3(%arg0: i32) -> (i32, i32) {
    %c0_i32 = arith.constant 0 : i32
    %c0_i32_0 = arith.constant 0 : i32
    %c0_i32_1 = arith.constant 0 : i32
    return %c0_i32, %c0_i32_0 : i32, i32
  }
  func.func @transform_4(%arg0: i32) -> (i32, i32) {
    %c0_i32 = arith.constant 0 : i32
    %c0_i32_0 = arith.constant 0 : i32
    %c0_i32_1 = arith.constant 0 : i32
    return %c0_i32, %c0_i32_0 : i32, i32
  }
  func.func @transform_5(%arg0: i32) -> (i32, i32) {
    %c0_i32 = arith.constant 0 : i32
    %c0_i32_0 = arith.constant 0 : i32
    return %arg0, %c0_i32 : i32, i32
  }
}

</mosaic_0001>

<bundles_post_ra>
// kernel: tpu_custom_call.1
= control target key start
LH: loop header
LB: loop body
LE: loop exit
PB: predicated region body
PF: predicated region fallthrough
CT: control target
= control target key end

     0   :  { %s788_s18 = smov 0   ;;  %s898_s0 = inlined_call_operand.vmem [shape: f32[320,16], index: 0, kind: input, shape index: {}]   ;;  %s899_s1 = inlined_call_operand.vmem [shape: f32[16,128], index: 1, kind: input, shape index: {}]   ;;  %s900_s2 = inlined_call_operand.vmem [shape: f32[1,128], index: 2, kind: input, shape index: {}]   ;;  %s901_s3 = inlined_call_operand.vmem [shape: f32[128,16], index: 3, kind: input, shape index: {}]   ;;  %s902_s4 = inlined_call_operand.vmem [shape: f32[1,16], index: 4, kind: input, shape index: {}]   ;;  %s903_s5 = inlined_call_operand.vmem [shape: f32[320,16], index: 5, kind: output, shape index: {}]  }
   0x1 LB: > { %s575_s19 = sadd.s32 4294967295, %s756_s18   ;;  %p579_p0 = scmp.ge.s32.totalorder %s756_s18, 1  ;;  %s756_s18 = sphi %s788_s18, %s15_s18  }
   0x2   : > { %p188_p1 = scmp.lt.s32.totalorder %s756_s18, 6 }
   0x4   : > { %p189_p2 = pnand %p579_p0, %p188_p1 }
   0x5   : > { %v236_v0 = vld [vmem:[%s899_s1] sm:$0xff] (!%p189_p2)  ;;  %v237_v1 = vld [vmem:[%s899_s1 + $0x8] sm:$0xff] (!%p189_p2)  ;;  %s580_s24 = sshll.u32 (!%p189_p2), %s575_s19, 3  ;;  %v385_v5 = vld [vmem:[%s901_s3 + $0x10] sm:$0xff] (!%p189_p2)  ;;  %vm245_vm0 = vcmask (!%p189_p2), 130048  }
   0x6   : > { %192 = sbr.rel (%p189_p2) target bundleno = 464 (0x1d0), region = 40  ;;  %v383_v2 = vld [vmem:[%s901_s3] sm:$0xff] (!%p189_p2)  ;;  %v690_v3 = vpack.c.bf16 (!%p189_p2), %v237_v1, %v236_v0  ;;  %p217_p3 = scmp.lt.s32.totalorder (!%p189_p2), %s580_s24, 39  ;;  %v384_v4 = vld [vmem:[%s901_s3 + $0x8] sm:$0xff] (!%p189_p2)  ;;  %v386_v6 = vld [vmem:[%s901_s3 + $0x18] sm:$0xff] (!%p189_p2) }
   0x7   : > { %v694_v7 = vpack.c.bf16 (!%p189_p2), %v384_v4, %v383_v2  ;;  %v698_v8 = vpack.c.bf16 (!%p189_p2), %v386_v6, %v385_v5  ;;  %v387_v9 = vld [vmem:[%s901_s3 + $0x20] sm:$0xff] (!%p189_p2)  ;;  %v388_v10 = vld [vmem:[%s901_s3 + $0x28] sm:$0xff] (!%p189_p2)  ;;  %v389_v16 = vld [vmem:[%s901_s3 + $0x30] sm:$0xff] (!%p189_p2) }
   0x8   : > { %691 = vmatprep.subr.bf16.mxu0 (!%p189_p2), %v690_v3  ;;  %v702_v14 = vpack.c.bf16 (!%p189_p2), %v388_v10, %v387_v9  ;;  %v390_v17 = vld [vmem:[%s901_s3 + $0x38] sm:$0xff] (!%p189_p2)  ;;  %v391_v21 = vld [vmem:[%s901_s3 + $0x40] sm:$0xff] (!%p189_p2)  ;;  %v392_v22 = vld [vmem:[%s901_s3 + $0x48] sm:$0xff] (!%p189_p2) }
   0x9   : > { %693 = vmatpush3.bf16.msra.mxu0 (!%p189_p2), %v690_v3  ;;  %726 = vmatprep.subr.bf16.mxu1 (!%p189_p2), %v694_v7  ;;  %v706_v19 = vpack.c.bf16 (!%p189_p2), %v390_v17, %v389_v16  ;;  %v710_v24 = vpack.c.bf16 (!%p189_p2), %v392_v22, %v391_v21  ;;  %v393_v25 = vld [vmem:[%s901_s3 + $0x50] sm:$0xff] (!%p189_p2)  ;;  %v394_v26 = vld [vmem:[%s901_s3 + $0x58] sm:$0xff] (!%p189_p2)  ;;  %v395_v29 = vld [vmem:[%s901_s3 + $0x60] sm:$0xff] (!%p189_p2) }
   0xa   : > { %695 = vmatprep.subr.bf16.mxu0 (!%p189_p2), %v694_v7  ;;  %734 = vmatpush3.bf16.msra.mxu1 (!%p189_p2), %v694_v7  ;;  %v714_v28 = vpack.c.bf16 (!%p189_p2), %v394_v26, %v393_v25  ;;  %v396_v30 = vld [vmem:[%s901_s3 + $0x68] sm:$0xff] (!%p189_p2)  ;;  %v397_v32 = vld [vmem:[%s901_s3 + $0x70] sm:$0xff] (!%p189_p2)  ;;  %v398_v33 = vld [vmem:[%s901_s3 + $0x78] sm:$0xff] (!%p189_p2) }
   0xb   : > { %727 = vmatprep.subr.bf16.mxu1 (!%p189_p2), %v698_v8  ;;  %v718_v31 = vpack.c.bf16 (!%p189_p2), %v396_v30, %v395_v29  ;;  %v722_v34 = vpack.c.bf16 (!%p189_p2), %v398_v33, %v397_v32  ;;  %v584_v35 = vld [vmem:[%s900_s2] ss:$0 sm:$0xff] (!%p189_p2) }
   0xc   : > { %v593_v60 = vld [vmem:[%s902_s4] ss:$0 sm:$0xff] (!%p189_p2) }
   0xd   : > { %s905_s24 = smov (!%p217_p3, %s580_s24), 39 }
   0xe   : > { %s581_s8 = sshll.u32 %s905_s24, 3  ;;  %735 = vmatpush3.bf16.msra.mxu1 %v698_v8 }
   0xf   : > { %s822_s11 = scalar_lea.vmem %s898_s0, %s581_s8  ;;  %728 = vmatprep.subr.bf16.mxu1 %v702_v14  ;;  %s226_s21 = scalar_lea.vmem %s903_s5, %s581_s8 }
  0x10   : > { %v228_v11 = vld [vmem:[%s822_s11] sm:$0xff]  ;;  %v229_v12 = vld [vmem:[%s822_s11 + $0x8] sm:$0xff]  ;;  %v230_v13 = vld [vmem:[%s822_s11 + $0x10] sm:$0xff] }
  0x11   : > { %634 = vmatprep.mubr.msk.f32.mxu0 %vm245_vm0, %v228_v11  ;;  %v231_v15 = vld [vmem:[%s822_s11 + $0x18] sm:$0xff]  ;;  %v232_v18 = vld [vmem:[%s822_s11 + $0x20] sm:$0xff]  ;;  %v233_v20 = vld [vmem:[%s822_s11 + $0x28] sm:$0xff] }
  0x12   : > { %635 = vmatmul.mubr.msk.f32.vlgmr.msra.gmra.mrb[0].mxu0 %vm245_vm0, %v229_v12  ;;  %736 = vmatpush3.bf16.msra.mxu1 %v702_v14  ;;  %v234_v23 = vld [vmem:[%s822_s11 + $0x30] sm:$0xff]  ;;  %v235_v27 = vld [vmem:[%s822_s11 + $0x38] sm:$0xff] }
  0x13   : > { %637 = vmatprep.mubr.msk.f32.mxu0 %vm245_vm0, %v230_v13  ;;  %697 = vmatpush3.bf16.msra.mxu0 %v694_v7 }
  0x14   : > { %699 = vmatprep.subr.bf16.mxu0 %v698_v8  ;;  %729 = vmatprep.subr.bf16.mxu1 %v706_v19 }
  0x16   : > { %638 = vmatmul.mubr.msk.f32.gmra.mrb[2].mxu0 %vm245_vm0, %v231_v15  ;;  %737 = vmatpush3.bf16.msra.mxu1 %v706_v19 }
  0x17   : > { %640 = vmatprep.mubr.msk.f32.mxu0 %vm245_vm0, %v232_v18  ;;  %701 = vmatpush3.bf16.msra.mxu0 %v698_v8 }
  0x18   : > { %703 = vmatprep.subr.bf16.mxu0 %v702_v14  ;;  %730 = vmatprep.subr.bf16.mxu1 %v710_v24 }
  0x1a   : > { %641 = vmatmul.mubr.msk.f32.gmra.mrb[4].mxu0 %vm245_vm0, %v233_v20  ;;  %738 = vmatpush3.bf16.msra.mxu1 %v710_v24 }
  0x1b   : > { %643 = vmatprep.mubr.msk.f32.mxu0 %vm245_vm0, %v234_v23  ;;  %705 = vmatpush3.bf16.msra.mxu0 %v702_v14 }
  0x1c   : > { %707 = vmatprep.subr.bf16.mxu0 %v706_v19  ;;  %731 = vmatprep.subr.bf16.mxu1 %v714_v28 }
  0x1e   : > { %644 = vmatmul.mubr.msk.f32.gmra.mrb[6].mxu0 %vm245_vm0, %v235_v27  ;;  %739 = vmatpush3.bf16.msra.mxu1 %v714_v28 }
  0x1f   : > { %709 = vmatpush3.bf16.msra.mxu0 %v706_v19  ;;  %732 = vmatprep.subr.bf16.mxu1 %v718_v31 }
  0x20   : > { %711 = vmatprep.subr.bf16.mxu0 %v710_v24 }
  0x22   : > { %740 = vmatpush3.bf16.msra.mxu1 %v718_v31 }
  0x23   : > { %713 = vmatpush3.bf16.msra.mxu0 %v710_v24  ;;  %733 = vmatprep.subr.bf16.mxu1 %v722_v34 }
  0x24   : > { %715 = vmatprep.subr.bf16.mxu0 %v714_v28 }
  0x26   : > { %741 = vmatpush3.bf16.msra.mxu1 %v722_v34 }
  0x27   : > { %717 = vmatpush3.bf16.msra.mxu0 %v714_v28 }
  0x28   : > { %719 = vmatprep.subr.bf16.mxu0 %v718_v31 }
  0x2b   : > { %721 = vmatpush3.bf16.msra.mxu0 %v718_v31 }
  0x2c   : > { %723 = vmatprep.subr.bf16.mxu0 %v722_v34 }
  0x2f   : > { %725 = vmatpush3.bf16.msra.mxu0 %v722_v34 }
  0xe5   : > { %v636_v36 = vpop.f32.mrb[0].mxu0 }
  0xe6   : > { %v342_v37 = vadd.f32 %v636_v36, %v584_v35  ;;  %v336_v38 = vpop.f32.mrb[1].mxu0 }
  0xe7   : > { %v337_v39 = vadd.f32 %v584_v35, %v336_v38 }
  0xe8   : > { %v376_v42 = vmax.f32 %v342_v37, 0.0 }
  0xe9   : > { %v375_v40 = vmax.f32 %v337_v39, 0.0  ;;  %v639_v41 = vpop.f32.mrb[2].mxu0 }
  0xea   : > { %v352_v43 = vadd.f32 %v639_v41, %v584_v35  ;;  %v346_v44 = vpop.f32.mrb[3].mxu0 }
  0xeb   : > { %678 = vmatprep.mubr.f32.mxu0 %v375_v40  ;;  %v347_v45 = vadd.f32 %v584_v35, %v346_v44 }
  0xec   : > { %679 = vmatmul.mubr.f32.vlgmr.msra.gmra.mrb[8].mxu0 %v376_v42  ;;  %v378_v48 = vmax.f32 %v352_v43, 0.0 }
  0xed   : > { %v642_v46 = vpop.f32.mrb[4].mxu0  ;;  %v377_v47 = vmax.f32 %v347_v45, 0.0 }
  0xee   : > { %v362_v49 = vadd.f32 %v642_v46, %v584_v35  ;;  %v356_v50 = vpop.f32.mrb[5].mxu0 }
  0xef   : > { %v357_v51 = vadd.f32 %v584_v35, %v356_v50  ;;  %681 = vmatprep.mubr.f32.mxu1 %v377_v47 }
  0xf0   : > { %682 = vmatmul.mubr.f32.vlgmr.msra.gmra.mrb[0].mxu1 %v378_v48  ;;  %v380_v54 = vmax.f32 %v362_v49, 0.0 }
  0xf1   : > { %v379_v52 = vmax.f32 %v357_v51, 0.0  ;;  %v645_v53 = vpop.f32.mrb[6].mxu0 }
  0xf2   : > { %v372_v55 = vadd.f32 %v645_v53, %v584_v35  ;;  %v366_v56 = vpop.f32.mrb[7].mxu0 }
  0xf3   : > { %v367_v57 = vadd.f32 %v584_v35, %v366_v56  ;;  %684 = vmatprep.mubr.f32.mxu1 %v379_v52 }
  0xf4   : > { %685 = vmatmul.mubr.f32.gmra.mrb[2].mxu1 %v380_v54  ;;  %v382_v59 = vmax.f32 %v372_v55, 0.0 }
  0xf5   : > { %v381_v58 = vmax.f32 %v367_v57, 0.0 }
  0xf7   : > { %687 = vmatprep.mubr.f32.mxu1 %v381_v58 }
  0xf8   : > { %688 = vmatmul.mubr.f32.gmra.mrb[4].mxu1 %v382_v59 }
 0x1bf   : > { %v680_v61 = vpop.f32.mrb[8].mxu0 }
 0x1c0   : > { %v478_v62 = vadd.f32 %v680_v61, %v593_v60  ;;  %v472_v63 = vpop.f32.mrb[9].mxu0 }
 0x1c1   : > { %v473_v0 = vadd.f32 %v593_v60, %v472_v63 }
 0x1c2   : > { %512 = vst.msk [vmem:[%s226_s21 + $0x8] sm:$0xff] %vm245_vm0, %v478_v62 }
 0x1c3   : > { %511 = vst.msk [vmem:[%s226_s21] sm:$0xff] %vm245_vm0, %v473_v0  ;;  %v683_v1 = vpop.f32.mrb[0].mxu1 }
 0x1c4   : > { %v488_v2 = vadd.f32 %v683_v1, %v593_v60  ;;  %v482_v3 = vpop.f32.mrb[1].mxu1 }
 0x1c5   : > { %v483_v4 = vadd.f32 %v593_v60, %v482_v3 }
 0x1c6   : > { %514 = vst.msk [vmem:[%s226_s21 + $0x18] sm:$0xff] %vm245_vm0, %v488_v2 }
 0x1c7   : > { %513 = vst.msk [vmem:[%s226_s21 + $0x10] sm:$0xff] %vm245_vm0, %v483_v4  ;;  %v686_v5 = vpop.f32.mrb[2].mxu1 }
 0x1c8   : > { %v498_v6 = vadd.f32 %v686_v5, %v593_v60  ;;  %v492_v7 = vpop.f32.mrb[3].mxu1 }
 0x1c9   : > { %v493_v8 = vadd.f32 %v593_v60, %v492_v7 }
 0x1ca   : > { %516 = vst.msk [vmem:[%s226_s21 + $0x28] sm:$0xff] %vm245_vm0, %v498_v6 }
 0x1cb   : > { %515 = vst.msk [vmem:[%s226_s21 + $0x20] sm:$0xff] %vm245_vm0, %v493_v8  ;;  %v689_v9 = vpop.f32.mrb[4].mxu1 }
 0x1cc   : > { %v508_v10 = vadd.f32 %v689_v9, %v593_v60  ;;  %v502_v11 = vpop.f32.mrb[5].mxu1 }
 0x1cd   : > { %v503_v12 = vadd.f32 %v593_v60, %v502_v11 }
 0x1ce   : > { %518 = vst.msk [vmem:[%s226_s21 + $0x38] sm:$0xff] %vm245_vm0, %v508_v10 }
 0x1cf   : > { %517 = vst.msk [vmem:[%s226_s21 + $0x30] sm:$0xff] %vm245_vm0, %v503_v12 }
 0x1d0 PF: > { %s15_s18 = sadd.s32 1, %s756_s18  }
 0x1d1   : > { %p12_p4 = scmp.ge.s32.totalorder %s15_s18, 7  }
 0x1d3   :  { %14 = sbr.rel (!%p12_p4) target bundleno = 1 (0x1), region = 70 }

</bundles_post_ra>
